<compile_context>
chip_gen: v7x
topology: tpu7x:2x2x1
jax: 0.10.0
libtpu: 0.0.40
codegen_flags: <defaults>
</compile_context>

<pallas_src>
import functools

import jax
import jax.numpy as jnp
from jax.experimental import pallas as pl
from jax.experimental.pallas import tpu as pltpu


def _round_up(n, m):
    return -(-n // m) * m


def _choose_tb(B):
    """Batch tile size: big tiles for big batches, >=2 steps for v7x megacore."""
    if B <= 16:
        return _round_up(B, 8)
    if B <= 512:
        return _round_up(B, 16)          # single tile, bf16 sublane pack
    # Amortize ~0.35us/step pipeline overhead but keep >=2 parallel grid steps
    # so v7x's two TensorCores both get a share of the batch.
    return min(4096, _round_up(pl.cdiv(B, 2), 256))


def _head_kernel(x_ref,                      # (TB, F)         f32
                 w1_ref, b1_ref,             # (F, H1p) bf16, (1, H1p) f32
                 w2_ref, b2_ref,             # (H1p, H2p) bf16, (1, H2p) f32
                 w3_ref, b3_ref,             # (H2p, C) bf16, (1, C) f32
                 o_ref):                     # (TB, C)         f32
    # f32 -> bf16 cast rides in VPU slack; BN affines + biases already folded.
    x = x_ref[...].astype(jnp.bfloat16)

    # dense (BN0 + BN1 + bias folded) -> relu
    h1 = jnp.dot(x, w1_ref[...], preferred_element_type=jnp.float32) + b1_ref[...]
    h1 = jnp.maximum(h1, 0.0).astype(jnp.bfloat16)

    # dense_1 (BN2 + bias folded) -> relu
    h2 = jnp.dot(h1, w2_ref[...], preferred_element_type=jnp.float32) + b2_ref[...]
    h2 = jnp.maximum(h2, 0.0).astype(jnp.bfloat16)

    # out_proj (narrow, unpadded output columns)
    out = jnp.dot(h2, w3_ref[...], preferred_element_type=jnp.float32) + b3_ref[...]
    o_ref[...] = out.astype(o_ref.dtype)


def prepare_head_params(params, eps=1e-5):
    """One-time fold of BN affines + biases into bf16 MXU weights (done in f32)."""
    f32 = jnp.float32

    def fold_bn(g, b, m, v):
        scale = g / jnp.sqrt(v + eps)
        shift = b - m * scale
        return scale.astype(f32), shift.astype(f32)

    s0, t0 = fold_bn(params["bn0_g"], params["bn0_b"], params["bn0_m"], params["bn0_v"])
    s1, t1 = fold_bn(params["bn1_g"], params["bn1_b"], params["bn1_m"], params["bn1_v"])
    s2, t2 = fold_bn(params["bn2_g"], params["bn2_b"], params["bn2_m"], params["bn2_v"])

    w1, b1 = params["w1"].astype(f32), params["b1"].astype(f32)
    w2, b2 = params["w2"].astype(f32), params["b2"].astype(f32)
    w3, b3 = params["w3"].astype(f32), params["b3"].astype(f32)

    # layer1: relu(((x*s0+t0) @ W1 + b1) * s1 + t1)
    #       = relu(x @ (s0[:,None]*W1*s1[None,:]) + ((t0@W1 + b1)*s1 + t1))
    w1f = (s0[:, None] * w1) * s1[None, :]
    b1f = (t0 @ w1 + b1) * s1 + t1
    # layer2: relu((h1 @ W2 + b2) * s2 + t2) = relu(h1 @ (W2*s2) + (b2*s2 + t2))
    w2f = w2 * s2[None, :]
    b2f = b2 * s2 + t2
    w3f, b3f = w3, b3

    F, H1 = w1f.shape
    H2 = w2f.shape[1]
    C = w3f.shape[1]

    # Zero-pad hidden widths to full 128-lane multiples (padded cols stay 0
    # through relu and contribute nothing downstream -> math unchanged).
    H1p = _round_up(max(H1, 128), 128)
    H2p = _round_up(max(H2, 128), 128)

    w1p = jnp.zeros((F, H1p), f32).at[:, :H1].set(w1f)
    b1p = jnp.zeros((H1p,), f32).at[:H1].set(b1f)
    w2p = jnp.zeros((H1p, H2p), f32).at[:H1, :H2].set(w2f)
    b2p = jnp.zeros((H2p,), f32).at[:H2].set(b2f)
    w3p = jnp.zeros((H2p, C), f32).at[:H2, :].set(w3f)
    b3p = b3f

    return {
        "w1": w1p.astype(jnp.bfloat16), "b1": b1p[None, :].astype(f32),
        "w2": w2p.astype(jnp.bfloat16), "b2": b2p[None, :].astype(f32),
        "w3": w3p.astype(jnp.bfloat16), "b3": b3p[None, :].astype(f32),
    }


@jax.jit
def classification_head(x, prepped):
    """x: (B, out_size) f32. prepped: output of prepare_head_params."""
    w1, b1 = prepped["w1"], prepped["b1"]
    w2, b2 = prepped["w2"], prepped["b2"]
    w3, b3 = prepped["w3"], prepped["b3"]

    B, F = x.shape
    H1p = w1.shape[1]
    H2p = w2.shape[1]
    C = w3.shape[1]

    TB = _choose_tb(B)
    grid = (pl.cdiv(B, TB),)
    B_eff = grid[0] * TB

    cost = pl.CostEstimate(
        flops=2 * B_eff * (F * H1p + H1p * H2p + H2p * C),
        transcendentals=0,
        bytes_accessed=(B_eff * F * 4                                   # x (f32)
                        + (F * H1p + H1p * H2p + H2p * C) * 2           # weights bf16
                        + (H1p + H2p + C) * 4                           # biases f32
                        + B_eff * C * 4),                               # narrow output
    )

    return pl.pallas_call(
        _head_kernel,
        out_shape=jax.ShapeDtypeStruct((B, C), jnp.float32),
        grid_spec=pltpu.PrefetchScalarGridSpec(
            num_scalar_prefetch=0,
            grid=grid,
            in_specs=[
                pl.BlockSpec((TB, F), lambda i: (i, 0)),      # x tile (streams)
                pl.BlockSpec((F, H1p), lambda i: (0, 0)),     # w1 (resident)
                pl.BlockSpec((1, H1p), lambda i: (0, 0)),     # b1
                pl.BlockSpec((H1p, H2p), lambda i: (0, 0)),   # w2
                pl.BlockSpec((1, H2p), lambda i: (0, 0)),     # b2
                pl.BlockSpec((H2p, C), lambda i: (0, 0)),     # w3 (narrow cols)
                pl.BlockSpec((1, C), lambda i: (0, 0)),       # b3
            ],
            out_specs=pl.BlockSpec((TB, C), lambda i: (i, 0)),
        ),
        compiler_params=pltpu.CompilerParams(
            dimension_semantics=("parallel",),
        ),
        cost_estimate=cost,
    )(x, w1, b1, w2, b2, w3, b3)


def _reference(x, params, eps=1e-5):
    """Pure-JAX eval-mode reference (BN with running stats, dropout = id)."""
    def bn(v, g, b, m, var):
        return (v - m) / jnp.sqrt(var + eps) * g + b
    h = bn(x, params["bn0_g"], params["bn0_b"], params["bn0_m"], params["bn0_v"])
    h = h @ params["w1"] + params["b1"]
    h = jnp.maximum(bn(h, params["bn1_g"], params["bn1_b"], params["bn1_m"], params["bn1_v"]), 0.0)
    h = h @ params["w2"] + params["b2"]
    h = jnp.maximum(bn(h, params["bn2_g"], params["bn2_b"], params["bn2_m"], params["bn2_v"]), 0.0)
    return h @ params["w3"] + params["b3"]


def init_params(key, out_size, hidden1, hidden2, num_label):
    ks = jax.random.split(key, 6)
    p = {}
    p["bn0_g"] = jnp.ones((out_size,), jnp.float32)
    p["bn0_b"] = jnp.zeros((out_size,), jnp.float32)
    p["bn0_m"] = 0.1 * jnp.arange(out_size, dtype=jnp.float32) / out_size
    p["bn0_v"] = jnp.ones((out_size,), jnp.float32)

    p["bn1_g"] = jnp.ones((hidden1,), jnp.float32)
    p["bn1_b"] = jnp.zeros((hidden1,), jnp.float32)
    p["bn1_m"] = jnp.zeros((hidden1,), jnp.float32)
    p["bn1_v"] = jnp.ones((hidden1,), jnp.float32)

    p["bn2_g"] = jnp.ones((hidden2,), jnp.float32)
    p["bn2_b"] = jnp.zeros((hidden2,), jnp.float32)
    p["bn2_m"] = jnp.zeros((hidden2,), jnp.float32)
    p["bn2_v"] = jnp.ones((hidden2,), jnp.float32)

    # Linear weights stored as (in, out)  (transpose of PyTorch's (out, in))
    p["w1"] = 0.05 * jax.random.normal(ks[0], (out_size, hidden1), jnp.float32)
    p["b1"] = 0.01 * jax.random.normal(ks[1], (hidden1,), jnp.float32)
    p["w2"] = 0.05 * jax.random.normal(ks[2], (hidden1, hidden2), jnp.float32)
    p["b2"] = 0.01 * jax.random.normal(ks[3], (hidden2,), jnp.float32)
    p["w3"] = 0.05 * jax.random.normal(ks[4], (hidden2, num_label), jnp.float32)
    p["b3"] = 0.01 * jax.random.normal(ks[5], (num_label,), jnp.float32)
    return p


if __name__ == "__main__":
    # args: out_size=32, linear_layer_size=[64, 32], num_label=4
    B, OUT_SIZE, H1, H2, NUM_LABEL = 8, 32, 64, 32, 4

    key = jax.random.PRNGKey(0)
    k_x, k_p = jax.random.split(key)
    x = jax.random.normal(k_x, (B, OUT_SIZE), jnp.float32)
    params = init_params(k_p, OUT_SIZE, H1, H2, NUM_LABEL)

    prepped = prepare_head_params(params)          # one-time weight prep
    out = classification_head(x, prepped)
    jax.block_until_ready(out)

    assert out.shape == (B, NUM_LABEL)
    assert bool(jnp.all(jnp.isfinite(out)))

    ref = _reference(x, params)
    assert bool(jnp.allclose(out, ref, atol=5e-2, rtol=5e-2)), (
        "kernel vs reference mismatch")

    print("KERNEL_OK")
</pallas_src>

<mosaic_0001>
module attributes {stable_mosaic.version = 11 : i64} {
  func.func @_head_kernel(%arg0: i32, %arg1: memref<8x32xf32, #tpu.memory_space<vmem>>, %arg2: memref<32x128xbf16, #tpu.memory_space<vmem>>, %arg3: memref<1x128xf32, #tpu.memory_space<vmem>>, %arg4: memref<128x128xbf16, #tpu.memory_space<vmem>>, %arg5: memref<1x128xf32, #tpu.memory_space<vmem>>, %arg6: memref<128x4xbf16, #tpu.memory_space<vmem>>, %arg7: memref<1x4xf32, #tpu.memory_space<vmem>>, %arg8: memref<8x4xf32, #tpu.memory_space<vmem>>) attributes {dimension_semantics = [#tpu.dimension_semantics<parallel>], iteration_bounds = array<i64: 1>, scalar_prefetch = 0 : i64, scratch_operands = 0 : i64, tpu.core_type = #tpu.core_type<tc>, window_params = [{transform_indices = @transform_0, window_bounds = array<i64: 8, 32>}, {pipeline_mode = #tpu.pipeline_mode<synchronous>, transform_indices = @transform_1, window_bounds = array<i64: 32, 128>}, {pipeline_mode = #tpu.pipeline_mode<synchronous>, transform_indices = @transform_2, window_bounds = array<i64: 1, 128>}, {pipeline_mode = #tpu.pipeline_mode<synchronous>, transform_indices = @transform_3, window_bounds = array<i64: 128, 128>}, {pipeline_mode = #tpu.pipeline_mode<synchronous>, transform_indices = @transform_4, window_bounds = array<i64: 1, 128>}, {pipeline_mode = #tpu.pipeline_mode<synchronous>, transform_indices = @transform_5, window_bounds = array<i64: 128, 4>}, {pipeline_mode = #tpu.pipeline_mode<synchronous>, transform_indices = @transform_6, window_bounds = array<i64: 1, 4>}, {transform_indices = @transform_7, window_bounds = array<i64: 8, 4>}]} {
    %c0 = arith.constant 0 : index
    %c0_0 = arith.constant 0 : index
    %0 = vector.load %arg1[%c0, %c0_0] : memref<8x32xf32, #tpu.memory_space<vmem>>, vector<8x32xf32>
    %1 = arith.truncf %0 : vector<8x32xf32> to vector<8x32xbf16>
    %c0_1 = arith.constant 0 : index
    %c0_2 = arith.constant 0 : index
    %2 = vector.load %arg2[%c0_1, %c0_2] : memref<32x128xbf16, #tpu.memory_space<vmem>>, vector<32x128xbf16>
    %cst = arith.constant dense<0.000000e+00> : vector<8x128xf32>
    %3 = tpu.matmul %1, %2, %cst {dimension_numbers = #tpu.dot_dimension_numbers<[1], [0], [0], [1], [0, 0, 1, 1], [], []>} : vector<8x32xbf16>, vector<32x128xbf16>, vector<8x128xf32> -> vector<8x128xf32>
    %c0_3 = arith.constant 0 : index
    %c0_4 = arith.constant 0 : index
    %4 = vector.load %arg3[%c0_3, %c0_4] : memref<1x128xf32, #tpu.memory_space<vmem>>, vector<1x128xf32>
    %5 = vector.broadcast %4 : vector<1x128xf32> to vector<8x128xf32>
    %6 = arith.addf %3, %5 : vector<8x128xf32>
    %cst_5 = arith.constant 0.000000e+00 : f32
    %7 = vector.broadcast %cst_5 : f32 to vector<8x128xf32>
    %8 = arith.maximumf %6, %7 : vector<8x128xf32>
    %9 = arith.truncf %8 : vector<8x128xf32> to vector<8x128xbf16>
    %c0_6 = arith.constant 0 : index
    %c0_7 = arith.constant 0 : index
    %10 = vector.load %arg4[%c0_6, %c0_7] : memref<128x128xbf16, #tpu.memory_space<vmem>>, vector<128x128xbf16>
    %cst_8 = arith.constant dense<0.000000e+00> : vector<8x128xf32>
    %11 = tpu.matmul %9, %10, %cst_8 {dimension_numbers = #tpu.dot_dimension_numbers<[1], [0], [0], [1], [0, 0, 1, 1], [], []>} : vector<8x128xbf16>, vector<128x128xbf16>, vector<8x128xf32> -> vector<8x128xf32>
    %c0_9 = arith.constant 0 : index
    %c0_10 = arith.constant 0 : index
    %12 = vector.load %arg5[%c0_9, %c0_10] : memref<1x128xf32, #tpu.memory_space<vmem>>, vector<1x128xf32>
    %13 = vector.broadcast %12 : vector<1x128xf32> to vector<8x128xf32>
    %14 = arith.addf %11, %13 : vector<8x128xf32>
    %cst_11 = arith.constant 0.000000e+00 : f32
    %15 = vector.broadcast %cst_11 : f32 to vector<8x128xf32>
    %16 = arith.maximumf %14, %15 : vector<8x128xf32>
    %17 = arith.truncf %16 : vector<8x128xf32> to vector<8x128xbf16>
    %c0_12 = arith.constant 0 : index
    %c0_13 = arith.constant 0 : index
    %18 = vector.load %arg6[%c0_12, %c0_13] : memref<128x4xbf16, #tpu.memory_space<vmem>>, vector<128x4xbf16>
    %cst_14 = arith.constant dense<0.000000e+00> : vector<8x4xf32>
    %19 = tpu.matmul %17, %18, %cst_14 {dimension_numbers = #tpu.dot_dimension_numbers<[1], [0], [0], [1], [0, 0, 1, 1], [], []>} : vector<8x128xbf16>, vector<128x4xbf16>, vector<8x4xf32> -> vector<8x4xf32>
    %c0_15 = arith.constant 0 : index
    %c0_16 = arith.constant 0 : index
    %20 = vector.load %arg7[%c0_15, %c0_16] : memref<1x4xf32, #tpu.memory_space<vmem>>, vector<1x4xf32>
    %21 = vector.broadcast %20 : vector<1x4xf32> to vector<8x4xf32>
    %22 = arith.addf %19, %21 : vector<8x4xf32>
    %c0_17 = arith.constant 0 : index
    %c0_18 = arith.constant 0 : index
    %23 = vector.load %arg8[%c0_17, %c0_18] : memref<8x4xf32, #tpu.memory_space<vmem>>, vector<8x4xf32>
    tpu.vector_store %arg8[%c0_17, %c0_18], %22 {strides = array<i32>} : memref<8x4xf32, #tpu.memory_space<vmem>>, vector<8x4xf32>,
    return
  }
  func.func @transform_0(%arg0: i32) -> (i32, i32) {
    %c0_i32 = arith.constant 0 : i32
    %c0_i32_0 = arith.constant 0 : i32
    return %arg0, %c0_i32 : i32, i32
  }
  func.func @transform_1(%arg0: i32) -> (i32, i32) {
    %c0_i32 = arith.constant 0 : i32
    %c0_i32_0 = arith.constant 0 : i32
    %c0_i32_1 = arith.constant 0 : i32
    return %c0_i32, %c0_i32_0 : i32, i32
  }
  func.func @transform_2(%arg0: i32) -> (i32, i32) {
    %c0_i32 = arith.constant 0 : i32
    %c0_i32_0 = arith.constant 0 : i32
    %c0_i32_1 = arith.constant 0 : i32
    return %c0_i32, %c0_i32_0 : i32, i32
  }
  func.func @transform_3(%arg0: i32) -> (i32, i32) {
    %c0_i32 = arith.constant 0 : i32
    %c0_i32_0 = arith.constant 0 : i32
    %c0_i32_1 = arith.constant 0 : i32
    return %c0_i32, %c0_i32_0 : i32, i32
  }
  func.func @transform_4(%arg0: i32) -> (i32, i32) {
    %c0_i32 = arith.constant 0 : i32
    %c0_i32_0 = arith.constant 0 : i32
    %c0_i32_1 = arith.constant 0 : i32
    return %c0_i32, %c0_i32_0 : i32, i32
  }
  func.func @transform_5(%arg0: i32) -> (i32, i32) {
    %c0_i32 = arith.constant 0 : i32
    %c0_i32_0 = arith.constant 0 : i32
    %c0_i32_1 = arith.constant 0 : i32
    return %c0_i32, %c0_i32_0 : i32, i32
  }
  func.func @transform_6(%arg0: i32) -> (i32, i32) {
    %c0_i32 = arith.constant 0 : i32
    %c0_i32_0 = arith.constant 0 : i32
    %c0_i32_1 = arith.constant 0 : i32
    return %c0_i32, %c0_i32_0 : i32, i32
  }
  func.func @transform_7(%arg0: i32) -> (i32, i32) {
    %c0_i32 = arith.constant 0 : i32
    %c0_i32_0 = arith.constant 0 : i32
    return %arg0, %c0_i32 : i32, i32
  }
}

</mosaic_0001>

<bundles_post_ra>
// kernel: classification_head.1
= control target key start
LH: loop header
LB: loop body
LE: loop exit
PB: predicated region body
PF: predicated region fallthrough
CT: control target
= control target key end

     0   :  { %12 = vsyncpa [#allocation3], 0  ;;  %s477_s24 = smov [#allocation2]   ;;  %s622_s0 = inlined_call_operand.hbm [shape: f32[8,32], index: 0, kind: input, shape index: {}]   ;;  %s623_s1 = inlined_call_operand.vmem [shape: bf16[32,128], index: 1, kind: input, shape index: {}]   ;;  %s624_s2 = inlined_call_operand.vmem [shape: f32[1,128], index: 2, kind: input, shape index: {}]   ;;  %s625_s3 = inlined_call_operand.vmem [shape: bf16[128,128], index: 3, kind: input, shape index: {}]   ;;  %s626_s4 = inlined_call_operand.vmem [shape: f32[1,128], index: 4, kind: input, shape index: {}]   ;;  %s627_s5 = inlined_call_operand.vmem [shape: bf16[128,4], index: 5, kind: input, shape index: {}]   ;;  %s628_s6 = inlined_call_operand.vmem [shape: f32[1,4], index: 6, kind: input, shape index: {}]   ;;  %s629_s7 = inlined_call_operand.vmem [shape: f32[8,4], index: 7, kind: output, shape index: {}]  }
   0x1   :  { %s19_s25 = sshll.u32 %s477_s24, 4  ;;  %s453_s28 = scalar_lea.hbm %s622_s0, 128  ;;  %s20_s25 = int_to_ptr.vmem [resolvable:$true] %s19_s25 }
   0x2   :  { %p454_p0 = scmp.ne.s32.totalorder %s622_s0, %s453_s28  ;;  %p457_p1 = scmp.lt.u32.totalorder %s453_s28, %s622_s0 }
   0x4   :  { %p459_p2 = pnand %p457_p1, %p454_p0 }
   0x6   :  { %462 = shalt.err (!%p459_p2)
}
   0x7   :  { %s463_s10 = scalar_lea.vmem %s20_s25, 128  ;;  %p468_p4 = scmp.lt.s32.totalorder %s20_s25, %s20_s25 }
   0x8   :  { %p464_p3 = scmp.ne.s32.totalorder %s20_s25, %s463_s10  ;;  %p469_p5 = scmp.lt.s32.totalorder %s463_s10, %s463_s10 }
   0xa   :  { %p470_p6 = por %p469_p5, %p468_p4 }
   0xc   :  { %p471_p7 = pnand %p470_p6, %p464_p3 }
   0xe   :  { %474 = shalt.err (!%p471_p7)
}
   0xf   :  { %22 = dma.hbm_to_vmem [thread:$0]  %s622_s0, 128, %s20_s25, [#allocation3]  }
  0x10   :  { %475 = dma.done.wait [#allocation3], 128  }
  0x11   :  { %476 = vsyncadd [#allocation3], 4294967168  ;;  %v478_v0 = vmov 0.0   ;;  %vm479_vm0 = vmmov 0   ;;  %v435_v1 = vld [vmem:[%s623_s1] sm:$0xff]   ;;  %v436_v2 = vld [vmem:[%s623_s1 + $0x8] sm:$0xff]  }
  0x12   :  { %384 = vmatprep.subr.bf16.mxu0 %v478_v0  ;;  %388 = vmatprep.mubr.msk.bf16.mxu0 %vm479_vm0, %v478_v0  ;;  %v39_v3 = vld [vmem:[#allocation2] sm:$0xff]  ;;  %v438_v6 = vld [vmem:[%s625_s3 + $0x8] sm:$0xff]   ;;  %vm64_vm1 = vcmask 261120   ;;  %v439_v7 = vld [vmem:[%s625_s3 + $0x10] sm:$0xff]   ;;  %vm334_vm2 = vcmask 31744  }
  0x13   :  { %392 = vmatprep.subr.bf16.mxu1 %v478_v0  ;;  %408 = vmatprep.mubr.msk.bf16.mxu1 %vm479_vm0, %v478_v0  ;;  %v437_v4 = vld [vmem:[%s625_s3] sm:$0xff]   ;;  %v40_v5 = vpack.c.bf16 %v39_v3, %v39_v3  ;;  %v440_v8 = vld [vmem:[%s625_s3 + $0x18] sm:$0xff]   ;;  %v442_v10 = vld [vmem:[%s625_s3 + $0x28] sm:$0xff]  }
  0x14   :  { %385 = vmatpush3.bf16.msra.mxu0 %v435_v1  ;;  %393 = vmatpush3.bf16.msra.mxu1 %v437_v4  ;;  %v441_v9 = vld [vmem:[%s625_s3 + $0x20] sm:$0xff]   ;;  %v443_v11 = vld [vmem:[%s625_s3 + $0x30] sm:$0xff]   ;;  %v444_v12 = vld [vmem:[%s625_s3 + $0x38] sm:$0xff]  }
  0x15   :  { %386 = vmatprep.subr.bf16.mxu0 %v478_v0  ;;  %394 = vmatprep.subr.bf16.mxu1 %v478_v0  ;;  %v445_v13 = vld [vmem:[%s627_s5] sm:$0xff]   ;;  %v446_v14 = vld [vmem:[%s627_s5 + $0x8] sm:$0xff]   ;;  %v447_v15 = vld [vmem:[%s627_s5 + $0x10] sm:$0xff]  }
  0x16   :  { %v448_v16 = vld [vmem:[%s627_s5 + $0x18] sm:$0xff]   ;;  %v449_v17 = vld [vmem:[%s627_s5 + $0x20] sm:$0xff]   ;;  %v450_v18 = vld [vmem:[%s627_s5 + $0x28] sm:$0xff]  }
  0x17   :  { %v341_v19 = vld [vmem:[%s624_s2] ss:$0 sm:$0xff]  ;;  %v451_v27 = vld [vmem:[%s627_s5 + $0x30] sm:$0xff]   ;;  %v452_v28 = vld [vmem:[%s627_s5 + $0x38] sm:$0xff]  }
  0x18   :  { %387 = vmatpush3.bf16.msra.mxu0 %v436_v2  ;;  %395 = vmatpush3.bf16.msra.mxu1 %v438_v6  ;;  %v345_v29 = vld [vmem:[%s626_s4] ss:$0 sm:$0xff] }
  0x19   :  { %412 = vmatprep.subr.bf16.mxu0 %v478_v0  ;;  %396 = vmatprep.subr.bf16.mxu1 %v478_v0  ;;  %v354_v37 = vld [vmem:[%s628_s6] ss:$0 sm:$0xff] }
  0x1b   :  { %389 = vmatmul.mubr.msk.bf16.vlgmr.msra.gmra.mrb[0].mxu0 %vm64_vm1, %v40_v5 }
  0x1c   :  { %428 = vmatprep.mubr.msk.bf16.mxu0 %vm479_vm0, %v478_v0  ;;  %397 = vmatpush3.bf16.msra.mxu1 %v439_v7 }
  0x1d   :  { %398 = vmatprep.subr.bf16.mxu1 %v478_v0  ;;  %413 = vmatpush3.bf16.msra.mxu0 %v445_v13 }
  0x1e   :  { %414 = vmatprep.subr.bf16.mxu0 %v478_v0 }
  0x20   :  { %399 = vmatpush3.bf16.msra.mxu1 %v440_v8 }
  0x21   :  { %400 = vmatprep.subr.bf16.mxu1 %v478_v0  ;;  %415 = vmatpush3.bf16.msra.mxu0 %v446_v14 }
  0x22   :  { %416 = vmatprep.subr.bf16.mxu0 %v478_v0 }
  0x24   :  { %401 = vmatpush3.bf16.msra.mxu1 %v441_v9 }
  0x25   :  { %402 = vmatprep.subr.bf16.mxu1 %v478_v0  ;;  %417 = vmatpush3.bf16.msra.mxu0 %v447_v15 }
  0x26   :  { %418 = vmatprep.subr.bf16.mxu0 %v478_v0 }
  0x28   :  { %403 = vmatpush3.bf16.msra.mxu1 %v442_v10 }
  0x29   :  { %404 = vmatprep.subr.bf16.mxu1 %v478_v0  ;;  %419 = vmatpush3.bf16.msra.mxu0 %v448_v16 }
  0x2a   :  { %420 = vmatprep.subr.bf16.mxu0 %v478_v0 }
  0x2c   :  { %405 = vmatpush3.bf16.msra.mxu1 %v443_v11 }
  0x2d   :  { %406 = vmatprep.subr.bf16.mxu1 %v478_v0  ;;  %421 = vmatpush3.bf16.msra.mxu0 %v449_v17 }
  0x2e   :  { %422 = vmatprep.subr.bf16.mxu0 %v478_v0 }
  0x30   :  { %407 = vmatpush3.bf16.msra.mxu1 %v444_v12 }
  0x31   :  { %423 = vmatpush3.bf16.msra.mxu0 %v450_v18 }
  0x32   :  { %424 = vmatprep.subr.bf16.mxu0 %v478_v0 }
  0x35   :  { %425 = vmatpush3.bf16.msra.mxu0 %v451_v27 }
  0x36   :  { %426 = vmatprep.subr.bf16.mxu0 %v478_v0 }
  0x39   :  { %427 = vmatpush3.bf16.msra.mxu0 %v452_v28 }
  0xee   :  { %v102_v20 = vpop.f32.mrb[0].mxu0 }
  0xef   :  { %v103_v21 = vadd.f32 %v341_v19, %v102_v20  ;;  %v390_v22 = vpop.f32.mrb[1].mxu0 }
  0xf0   :  { %v105_v23 = vpop.f32.mrb[2].mxu0 }
  0xf1   :  { %v108_v24 = vmax.f32 %v103_v21, 0.0  ;;  %v391_v25 = vpop.f32.mrb[3].mxu0 }
  0xf3   :  { %v109_v26 = vpack.c.bf16 %v108_v24, %v108_v24 }
  0xf5   :  { %409 = vmatmul.mubr.bf16.vlgmr.msra.gmra.mrb[0].mxu1 %v109_v26 }
 0x1c8   :  { %v215_v30 = vpop.f32.mrb[0].mxu1 }
 0x1c9   :  { %v216_v31 = vadd.f32 %v345_v29, %v215_v30  ;;  %v410_v32 = vpop.f32.mrb[1].mxu1 }
 0x1ca   :  { %v218_v33 = vpop.f32.mrb[2].mxu1 }
 0x1cb   :  { %v221_v34 = vmax.f32 %v216_v31, 0.0  ;;  %v411_v35 = vpop.f32.mrb[3].mxu1 }
 0x1cd   :  { %v222_v36 = vpack.c.bf16 %v221_v34, %v221_v34 }
 0x1cf   :  { %429 = vmatmul.mubr.bf16.vlgmr.msra.gmra.mrb[4].mxu0 %v222_v36 }
 0x2a2   :  { %v328_v38 = vpop.f32.mrb[4].mxu0 }
 0x2a3   :  { %v329_v39 = vadd.f32 %v354_v37, %v328_v38  ;;  %v430_v40 = vpop.f32.mrb[5].mxu0 }
 0x2a4   :  { %v331_v41 = vpop.f32.mrb[6].mxu0 }
 0x2a5   :  { %335 = vst.msk [vmem:[%s629_s7] sm:$0xff] %vm334_vm2, %v329_v39  ;;  %v431_v42 = vpop.f32.mrb[7].mxu0 }
 0x2a6   :  { %340 = vsyncpa [#allocation3], 1 }

</bundles_post_ra>
